<compile_context>
chip_gen: v5e
topology: v5e:2x2
jax: 0.10.0
libtpu: 0.0.40
codegen_flags: <defaults>
</compile_context>

<pallas_src>
import jax
import jax.numpy as jnp
from jax.experimental import pallas as pl
from jax.experimental.pallas import tpu as pltpu


def _part_gate_kernel(xh_ref, xu_ref, xl_ref, w1_ref, b1_ref, w2_ref, b2_ref, o_ref):
    """One (batch, spatial-tile) grid step.

    xh/xu/xl_ref : (1, C, ts)   NCHW slab, spatial tokens on the lane axis
    w1_ref       : (3, Hd, C)   per-part conv1 weights (1x1 conv == matmul)
    b1_ref       : (3, Hd, 1)   per-part conv1 bias (f32)
    w2_ref       : (3, 3, Hd)   block-diagonal conv2: w2_ref[p] has only row p
                                nonzero (= conv2 weights of part p), f32
    b2_ref       : (3, 1)       per-part conv2 bias (f32)
    o_ref        : (1, 3, ts)   softmax weights over the 3 parts (f32)
    """
    w1 = w1_ref[...]
    b1 = b1_ref[...]
    w2 = w2_ref[...]

    acc = None
    for p, x_ref in enumerate((xh_ref, xu_ref, xl_ref)):
        x = x_ref[0]                                                 # (C, ts)
        # conv1 (1x1) + ReLU: (Hd, C) @ (C, ts) -> (Hd, ts)          [MXU, f32 acc]
        h = jnp.dot(w1[p], x, preferred_element_type=jnp.float32)
        h = jnp.maximum(h + b1[p], 0.0)
        # conv2 (1x1, single output channel) as a tiny MXU dot against the
        # zero-padded block row: (3, Hd) @ (Hd, ts) -> (3, ts), only row p != 0.
        contrib = jnp.dot(w2[p], h, preferred_element_type=jnp.float32)
        acc = contrib if acc is None else acc + contrib

    logits = acc + b2_ref[...]                                       # (3, ts)

    # Exact softmax over the 3 parts (exact normalisation; divide is hidden
    # under the input DMA since the kernel is HBM-read-bound).
    m = jnp.max(logits, axis=0, keepdims=True)
    e = jnp.exp(logits - m)                                          # EUP
    o_ref[0] = (e / jnp.sum(e, axis=0, keepdims=True)).astype(o_ref.dtype)


def _vmem_capacity_bytes():
    try:
        return int(pltpu.get_tpu_info().vmem_capacity_bytes)
    except Exception:
        return 64 << 20          # conservative default (v7x per-TensorCore)


def _pick_tile(S, N, C, itemsize, vmem_capacity):
    """Lane tile: as large as the VMEM budget allows, multiple of 128 (or full
    S), shrunk so the grid has >= ~8 steps for megacore/pipelining, but never
    below ~512 lanes (per-step overhead / DMA segment length)."""
    budget = min(24 << 20, vmem_capacity // 4)       # double-buffered 3x input tiles
    max_ts = budget // (3 * C * itemsize * 2)
    max_ts = max(128, (max_ts // 128) * 128)
    ts = min(S, max_ts)

    min_ts = min(512, ts)
    target_steps = 8
    while ts > min_ts and N * pl.cdiv(S, ts) < target_steps:
        ts = max(min_ts, ((ts // 2) // 128) * 128)

    if ts >= S:
        return S                 # full spatial extent (always legal)
    return (ts // 128) * 128


def part_weight_gate(x_head, x_upper, x_lower, params, *, ts=None):
    """params: 3-tuple (head, upper, lower) of (w1 (Hd,C), b1 (Hd,), w2 (Hd,), b2 ())."""
    N, C, H, W = x_head.shape
    S = H * W
    Hd = params[0][0].shape[0]
    act_dtype = x_head.dtype
    itemsize = jnp.dtype(act_dtype).itemsize

    # NCHW -> (N, C, S): free reshape, no transpose / extra HBM traffic.
    xs = [x.astype(act_dtype).reshape(N, C, S) for x in (x_head, x_upper, x_lower)]

    # Tiny per-part parameters; resident in VMEM across the whole grid
    # (constant index_maps).  W1 in activation dtype (bf16-friendly MXU),
    # biases / W2 block-diagonal in f32 (post-accumulation path).
    w1 = jnp.stack([p[0] for p in params]).astype(act_dtype)                    # (3, Hd, C)
    b1 = jnp.stack([p[1] for p in params]).astype(jnp.float32).reshape(3, Hd, 1)
    w2_stack = jnp.stack([p[2] for p in params]).astype(jnp.float32)            # (3, Hd)
    w2_bd = jnp.eye(3, dtype=jnp.float32)[:, :, None] * w2_stack[None, :, :]    # (3, 3, Hd)
    b2 = jnp.stack([p[3] for p in params]).astype(jnp.float32).reshape(3, 1)

    vmem_cap = _vmem_capacity_bytes()
    if ts is None:
        ts = _pick_tile(S, N, C, itemsize, vmem_cap)
    grid = (N, pl.cdiv(S, ts))

    x_spec = pl.BlockSpec((1, C, ts), lambda n, j: (n, 0, j))
    const3 = lambda n, j: (0, 0, 0)

    # VMEM budget: 3 double-buffered input tiles + double-buffered f32 output
    # tile + resident weights + slack; never more than half the generation's
    # VMEM capacity (safe on v7x's 64 MiB as well as v5e/v6e's 128 MiB).
    est = (2 * 3 * C * ts * itemsize
           + 2 * 3 * ts * 4
           + 3 * Hd * C * itemsize + 3 * Hd * 4 + 9 * Hd * 4 + 3 * 4
           + (2 << 20))
    vmem_bytes = int(min(max(est, 16 << 20), vmem_cap // 2))

    out = pl.pallas_call(
        _part_gate_kernel,
        out_shape=jax.ShapeDtypeStruct((N, 3, S), jnp.float32),
        grid_spec=pltpu.PrefetchScalarGridSpec(
            num_scalar_prefetch=0,
            grid=grid,
            in_specs=[
                x_spec, x_spec, x_spec,
                pl.BlockSpec((3, Hd, C), const3),
                pl.BlockSpec((3, Hd, 1), const3),
                pl.BlockSpec((3, 3, Hd), const3),
                pl.BlockSpec((3, 1), lambda n, j: (0, 0)),
            ],
            out_specs=pl.BlockSpec((1, 3, ts), lambda n, j: (n, 0, j)),
        ),
        compiler_params=pltpu.CompilerParams(
            dimension_semantics=("parallel", "parallel"),
            vmem_limit_bytes=vmem_bytes,
        ),
    )(*xs, w1, b1, w2_bd, b2)

    # (N, 3, S) -> (N, 3, H, W): free reshape, matches torch.cat on dim=1.
    return out.reshape(N, 3, H, W)


def _ref_forward(x_head, x_upper, x_lower, params):
    def fc(x, w1, b1, w2, b2):
        xt = jnp.transpose(x, (0, 2, 3, 1)).astype(jnp.float32)        # (N, H, W, C)
        h = jnp.maximum(jnp.einsum("nhwc,dc->nhwd", xt, w1.astype(jnp.float32)) + b1, 0.0)
        return jnp.einsum("nhwd,d->nhw", h, w2) + b2                   # (N, H, W)

    logits = jnp.stack(
        [fc(x, *p) for x, p in zip((x_head, x_upper, x_lower), params)], axis=1)
    return jax.nn.softmax(logits, axis=1)                              # (N, 3, H, W)


if __name__ == "__main__":
    # Small, deterministic configuration (in_dim = 32 -> hidden = 8).
    N, C, H, W = 2, 32, 16, 16
    Hd = C // 4

    key = jax.random.PRNGKey(0)
    keys = jax.random.split(key, 3 + 3 * 4)

    x_head = jax.random.normal(keys[0], (N, C, H, W), dtype=jnp.float32)
    x_upper = jax.random.normal(keys[1], (N, C, H, W), dtype=jnp.float32)
    x_lower = jax.random.normal(keys[2], (N, C, H, W), dtype=jnp.float32)

    # Three independent parameter sets (no_share), PyTorch conv orientation.
    params = []
    for p in range(3):
        kw1, kb1, kw2, kb2 = keys[3 + 4 * p: 3 + 4 * (p + 1)]
        params.append((
            jax.random.normal(kw1, (Hd, C), dtype=jnp.float32) * 0.1,  # conv1 weight
            jax.random.normal(kb1, (Hd,), dtype=jnp.float32) * 0.1,    # conv1 bias
            jax.random.normal(kw2, (Hd,), dtype=jnp.float32) * 0.1,    # conv2 weight
            jax.random.normal(kb2, (), dtype=jnp.float32) * 0.1,       # conv2 bias
        ))
    params = tuple(params)

    # --- f32 path ---------------------------------------------------------
    out = part_weight_gate(x_head, x_upper, x_lower, params)
    out = jax.block_until_ready(out)

    ref = _ref_forward(x_head, x_upper, x_lower, params)
    assert out.shape == (N, 3, H, W)
    assert jnp.allclose(out, ref, atol=1e-4, rtol=1e-4)
    # Exact softmax normalisation (no approximate reciprocal anymore).
    assert jnp.allclose(jnp.sum(out, axis=1), 1.0, atol=1e-4)

    # --- bf16 activation path (halves HBM read bytes; weights follow) ------
    xb = [x.astype(jnp.bfloat16) for x in (x_head, x_upper, x_lower)]
    out_bf16 = jax.block_until_ready(part_weight_gate(*xb, params))
    params_bf16 = tuple(
        (w1.astype(jnp.bfloat16).astype(jnp.float32), b1, w2, b2)
        for (w1, b1, w2, b2) in params)
    ref_bf16 = _ref_forward(*[x.astype(jnp.float32) for x in xb], params_bf16)
    assert out_bf16.shape == (N, 3, H, W)
    assert jnp.allclose(out_bf16, ref_bf16, atol=2e-2, rtol=2e-2)
    assert jnp.allclose(jnp.sum(out_bf16, axis=1), 1.0, atol=1e-3)

    print("KERNEL_OK")
</pallas_src>

<mosaic_0001>
module attributes {stable_mosaic.version = 11 : i64} {
  func.func @_part_gate_kernel(%arg0: i32, %arg1: i32, %arg2: memref<1x32x256xf32, #tpu.memory_space<vmem>>, %arg3: memref<1x32x256xf32, #tpu.memory_space<vmem>>, %arg4: memref<1x32x256xf32, #tpu.memory_space<vmem>>, %arg5: memref<3x8x32xf32, #tpu.memory_space<vmem>>, %arg6: memref<3x8x1xf32, #tpu.memory_space<vmem>>, %arg7: memref<3x3x8xf32, #tpu.memory_space<vmem>>, %arg8: memref<3x1xf32, #tpu.memory_space<vmem>>, %arg9: memref<1x3x256xf32, #tpu.memory_space<vmem>>) attributes {dimension_semantics = [#tpu.dimension_semantics<parallel>, #tpu.dimension_semantics<parallel>], iteration_bounds = array<i64: 2, 1>, scalar_prefetch = 0 : i64, scratch_operands = 0 : i64, tpu.core_type = #tpu.core_type<tc>, window_params = [{transform_indices = @transform_0, window_bounds = array<i64: 1, 32, 256>}, {transform_indices = @transform_1, window_bounds = array<i64: 1, 32, 256>}, {transform_indices = @transform_2, window_bounds = array<i64: 1, 32, 256>}, {pipeline_mode = #tpu.pipeline_mode<synchronous>, transform_indices = @transform_3, window_bounds = array<i64: 3, 8, 32>}, {pipeline_mode = #tpu.pipeline_mode<synchronous>, transform_indices = @transform_4, window_bounds = array<i64: 3, 8, 1>}, {pipeline_mode = #tpu.pipeline_mode<synchronous>, transform_indices = @transform_5, window_bounds = array<i64: 3, 3, 8>}, {pipeline_mode = #tpu.pipeline_mode<synchronous>, transform_indices = @transform_6, window_bounds = array<i64: 3, 1>}, {transform_indices = @transform_7, window_bounds = array<i64: 1, 3, 256>}]} {
    %c0 = arith.constant 0 : index
    %c0_0 = arith.constant 0 : index
    %c0_1 = arith.constant 0 : index
    %0 = vector.load %arg5[%c0, %c0_0, %c0_1] : memref<3x8x32xf32, #tpu.memory_space<vmem>>, vector<3x8x32xf32>
    %c0_2 = arith.constant 0 : index
    %c0_3 = arith.constant 0 : index
    %c0_4 = arith.constant 0 : index
    %1 = vector.load %arg6[%c0_2, %c0_3, %c0_4] : memref<3x8x1xf32, #tpu.memory_space<vmem>>, vector<3x8x1xf32>
    %c0_5 = arith.constant 0 : index
    %c0_6 = arith.constant 0 : index
    %c0_7 = arith.constant 0 : index
    %2 = vector.load %arg7[%c0_5, %c0_6, %c0_7] : memref<3x3x8xf32, #tpu.memory_space<vmem>>, vector<3x3x8xf32>
    %c0_8 = arith.constant 0 : index
    %c0_9 = arith.constant 0 : index
    %c0_10 = arith.constant 0 : index
    %3 = vector.load %arg2[%c0_8, %c0_9, %c0_10] : memref<1x32x256xf32, #tpu.memory_space<vmem>>, vector<1x32x256xf32>
    %4 = vector.shape_cast %3 : vector<1x32x256xf32> to vector<32x256xf32>
    %5 = vector.extract_strided_slice %0 {offsets = [0, 0, 0], sizes = [1, 8, 32], strides = [1, 1, 1]} : vector<3x8x32xf32> to vector<1x8x32xf32>
    %6 = vector.shape_cast %5 : vector<1x8x32xf32> to vector<8x32xf32>
    %cst = arith.constant dense<0.000000e+00> : vector<8x256xf32>
    %7 = tpu.matmul %6, %4, %cst {dimension_numbers = #tpu.dot_dimension_numbers<[1], [0], [0], [1], [0, 0, 1, 1], [], []>} : vector<8x32xf32>, vector<32x256xf32>, vector<8x256xf32> -> vector<8x256xf32>
    %8 = vector.extract_strided_slice %1 {offsets = [0, 0, 0], sizes = [1, 8, 1], strides = [1, 1, 1]} : vector<3x8x1xf32> to vector<1x8x1xf32>
    %9 = vector.shape_cast %8 : vector<1x8x1xf32> to vector<8x1xf32>
    %10 = vector.broadcast %9 : vector<8x1xf32> to vector<8x256xf32>
    %11 = arith.addf %7, %10 : vector<8x256xf32>
    %cst_11 = arith.constant 0.000000e+00 : f32
    %12 = vector.broadcast %cst_11 : f32 to vector<8x256xf32>
    %13 = arith.maximumf %11, %12 : vector<8x256xf32>
    %14 = vector.extract_strided_slice %2 {offsets = [0, 0, 0], sizes = [1, 3, 8], strides = [1, 1, 1]} : vector<3x3x8xf32> to vector<1x3x8xf32>
    %15 = vector.shape_cast %14 : vector<1x3x8xf32> to vector<3x8xf32>
    %cst_12 = arith.constant dense<0.000000e+00> : vector<3x256xf32>
    %16 = tpu.matmul %15, %13, %cst_12 {dimension_numbers = #tpu.dot_dimension_numbers<[1], [0], [0], [1], [0, 0, 1, 1], [], []>} : vector<3x8xf32>, vector<8x256xf32>, vector<3x256xf32> -> vector<3x256xf32>
    %c0_13 = arith.constant 0 : index
    %c0_14 = arith.constant 0 : index
    %c0_15 = arith.constant 0 : index
    %17 = vector.load %arg3[%c0_13, %c0_14, %c0_15] : memref<1x32x256xf32, #tpu.memory_space<vmem>>, vector<1x32x256xf32>
    %18 = vector.shape_cast %17 : vector<1x32x256xf32> to vector<32x256xf32>
    %19 = vector.extract_strided_slice %0 {offsets = [1, 0, 0], sizes = [1, 8, 32], strides = [1, 1, 1]} : vector<3x8x32xf32> to vector<1x8x32xf32>
    %20 = vector.shape_cast %19 : vector<1x8x32xf32> to vector<8x32xf32>
    %cst_16 = arith.constant dense<0.000000e+00> : vector<8x256xf32>
    %21 = tpu.matmul %20, %18, %cst_16 {dimension_numbers = #tpu.dot_dimension_numbers<[1], [0], [0], [1], [0, 0, 1, 1], [], []>} : vector<8x32xf32>, vector<32x256xf32>, vector<8x256xf32> -> vector<8x256xf32>
    %22 = vector.extract_strided_slice %1 {offsets = [1, 0, 0], sizes = [1, 8, 1], strides = [1, 1, 1]} : vector<3x8x1xf32> to vector<1x8x1xf32>
    %23 = vector.shape_cast %22 : vector<1x8x1xf32> to vector<8x1xf32>
    %24 = vector.broadcast %23 : vector<8x1xf32> to vector<8x256xf32>
    %25 = arith.addf %21, %24 : vector<8x256xf32>
    %cst_17 = arith.constant 0.000000e+00 : f32
    %26 = vector.broadcast %cst_17 : f32 to vector<8x256xf32>
    %27 = arith.maximumf %25, %26 : vector<8x256xf32>
    %28 = vector.extract_strided_slice %2 {offsets = [1, 0, 0], sizes = [1, 3, 8], strides = [1, 1, 1]} : vector<3x3x8xf32> to vector<1x3x8xf32>
    %29 = vector.shape_cast %28 : vector<1x3x8xf32> to vector<3x8xf32>
    %cst_18 = arith.constant dense<0.000000e+00> : vector<3x256xf32>
    %30 = tpu.matmul %29, %27, %cst_18 {dimension_numbers = #tpu.dot_dimension_numbers<[1], [0], [0], [1], [0, 0, 1, 1], [], []>} : vector<3x8xf32>, vector<8x256xf32>, vector<3x256xf32> -> vector<3x256xf32>
    %31 = arith.addf %16, %30 : vector<3x256xf32>
    %c0_19 = arith.constant 0 : index
    %c0_20 = arith.constant 0 : index
    %c0_21 = arith.constant 0 : index
    %32 = vector.load %arg4[%c0_19, %c0_20, %c0_21] : memref<1x32x256xf32, #tpu.memory_space<vmem>>, vector<1x32x256xf32>
    %33 = vector.shape_cast %32 : vector<1x32x256xf32> to vector<32x256xf32>
    %34 = vector.extract_strided_slice %0 {offsets = [2, 0, 0], sizes = [1, 8, 32], strides = [1, 1, 1]} : vector<3x8x32xf32> to vector<1x8x32xf32>
    %35 = vector.shape_cast %34 : vector<1x8x32xf32> to vector<8x32xf32>
    %cst_22 = arith.constant dense<0.000000e+00> : vector<8x256xf32>
    %36 = tpu.matmul %35, %33, %cst_22 {dimension_numbers = #tpu.dot_dimension_numbers<[1], [0], [0], [1], [0, 0, 1, 1], [], []>} : vector<8x32xf32>, vector<32x256xf32>, vector<8x256xf32> -> vector<8x256xf32>
    %37 = vector.extract_strided_slice %1 {offsets = [2, 0, 0], sizes = [1, 8, 1], strides = [1, 1, 1]} : vector<3x8x1xf32> to vector<1x8x1xf32>
    %38 = vector.shape_cast %37 : vector<1x8x1xf32> to vector<8x1xf32>
    %39 = vector.broadcast %38 : vector<8x1xf32> to vector<8x256xf32>
    %40 = arith.addf %36, %39 : vector<8x256xf32>
    %cst_23 = arith.constant 0.000000e+00 : f32
    %41 = vector.broadcast %cst_23 : f32 to vector<8x256xf32>
    %42 = arith.maximumf %40, %41 : vector<8x256xf32>
    %43 = vector.extract_strided_slice %2 {offsets = [2, 0, 0], sizes = [1, 3, 8], strides = [1, 1, 1]} : vector<3x3x8xf32> to vector<1x3x8xf32>
    %44 = vector.shape_cast %43 : vector<1x3x8xf32> to vector<3x8xf32>
    %cst_24 = arith.constant dense<0.000000e+00> : vector<3x256xf32>
    %45 = tpu.matmul %44, %42, %cst_24 {dimension_numbers = #tpu.dot_dimension_numbers<[1], [0], [0], [1], [0, 0, 1, 1], [], []>} : vector<3x8xf32>, vector<8x256xf32>, vector<3x256xf32> -> vector<3x256xf32>
    %46 = arith.addf %31, %45 : vector<3x256xf32>
    %c0_25 = arith.constant 0 : index
    %c0_26 = arith.constant 0 : index
    %47 = vector.load %arg8[%c0_25, %c0_26] : memref<3x1xf32, #tpu.memory_space<vmem>>, vector<3x1xf32>
    %48 = vector.broadcast %47 : vector<3x1xf32> to vector<3x256xf32>
    %49 = arith.addf %46, %48 : vector<3x256xf32>
    %cst_27 = arith.constant dense<0xFF800000> : vector<256xf32>
    %50 = vector.multi_reduction <maximumf>, %49, %cst_27 [0] : vector<3x256xf32> to vector<256xf32>
    %51 = vector.shape_cast %50 : vector<256xf32> to vector<1x256xf32>
    %52 = vector.broadcast %51 : vector<1x256xf32> to vector<3x256xf32>
    %53 = arith.subf %49, %52 : vector<3x256xf32>
    %54 = math.exp %53 : vector<3x256xf32>
    %cst_28 = arith.constant dense<0.000000e+00> : vector<256xf32>
    %55 = vector.multi_reduction <add>, %54, %cst_28 [0] : vector<3x256xf32> to vector<256xf32>
    %56 = vector.shape_cast %55 : vector<256xf32> to vector<1x256xf32>
    %57 = vector.broadcast %56 : vector<1x256xf32> to vector<3x256xf32>
    %58 = arith.divf %54, %57 : vector<3x256xf32>
    %c0_29 = arith.constant 0 : index
    %c0_30 = arith.constant 0 : index
    %c0_31 = arith.constant 0 : index
    %59 = vector.load %arg9[%c0_29, %c0_30, %c0_31] : memref<1x3x256xf32, #tpu.memory_space<vmem>>, vector<1x3x256xf32>
    %60 = vector.shape_cast %59 : vector<1x3x256xf32> to vector<3x256xf32>
    %61 = vector.shape_cast %58 : vector<3x256xf32> to vector<1x3x256xf32>
    tpu.vector_store %arg9[%c0_29, %c0_30, %c0_31], %61 {strides = array<i32>} : memref<1x3x256xf32, #tpu.memory_space<vmem>>, vector<1x3x256xf32>,
    return
  }
  func.func @transform_0(%arg0: i32, %arg1: i32) -> (i32, i32, i32) {
    %c0_i32 = arith.constant 0 : i32
    %c0_i32_0 = arith.constant 0 : i32
    return %arg0, %c0_i32, %arg1 : i32, i32, i32
  }
  func.func @transform_1(%arg0: i32, %arg1: i32) -> (i32, i32, i32) {
    %c0_i32 = arith.constant 0 : i32
    %c0_i32_0 = arith.constant 0 : i32
    return %arg0, %c0_i32, %arg1 : i32, i32, i32
  }
  func.func @transform_2(%arg0: i32, %arg1: i32) -> (i32, i32, i32) {
    %c0_i32 = arith.constant 0 : i32
    %c0_i32_0 = arith.constant 0 : i32
    return %arg0, %c0_i32, %arg1 : i32, i32, i32
  }
  func.func @transform_3(%arg0: i32, %arg1: i32) -> (i32, i32, i32) {
    %c0_i32 = arith.constant 0 : i32
    %c0_i32_0 = arith.constant 0 : i32
    %c0_i32_1 = arith.constant 0 : i32
    %c0_i32_2 = arith.constant 0 : i32
    return %c0_i32, %c0_i32_0, %c0_i32_1 : i32, i32, i32
  }
  func.func @transform_4(%arg0: i32, %arg1: i32) -> (i32, i32, i32) {
    %c0_i32 = arith.constant 0 : i32
    %c0_i32_0 = arith.constant 0 : i32
    %c0_i32_1 = arith.constant 0 : i32
    %c0_i32_2 = arith.constant 0 : i32
    return %c0_i32, %c0_i32_0, %c0_i32_1 : i32, i32, i32
  }
  func.func @transform_5(%arg0: i32, %arg1: i32) -> (i32, i32, i32) {
    %c0_i32 = arith.constant 0 : i32
    %c0_i32_0 = arith.constant 0 : i32
    %c0_i32_1 = arith.constant 0 : i32
    %c0_i32_2 = arith.constant 0 : i32
    return %c0_i32, %c0_i32_0, %c0_i32_1 : i32, i32, i32
  }
  func.func @transform_6(%arg0: i32, %arg1: i32) -> (i32, i32) {
    %c0_i32 = arith.constant 0 : i32
    %c0_i32_0 = arith.constant 0 : i32
    %c0_i32_1 = arith.constant 0 : i32
    return %c0_i32, %c0_i32_0 : i32, i32
  }
  func.func @transform_7(%arg0: i32, %arg1: i32) -> (i32, i32, i32) {
    %c0_i32 = arith.constant 0 : i32
    %c0_i32_0 = arith.constant 0 : i32
    return %arg0, %c0_i32, %arg1 : i32, i32, i32
  }
}

</mosaic_0001>

<bundles_post_ra>
// kernel: tpu_custom_call.1
= control target key start
LH: loop header
LB: loop body
LE: loop exit
PB: predicated region body
PF: predicated region fallthrough
CT: control target
= control target key end

     0   :  { %s1570_s0 = inlined_call_operand.hbm [shape: f32[2,32,256], index: 0, kind: input, shape index: {}]   ;;  %s1571_s1 = inlined_call_operand.hbm [shape: f32[2,32,256], index: 1, kind: input, shape index: {}]   ;;  %s1572_s2 = inlined_call_operand.hbm [shape: f32[2,32,256], index: 2, kind: input, shape index: {}]   ;;  %s1573_s3 = inlined_call_operand.vmem [shape: f32[3,8,32], index: 3, kind: input, shape index: {}]   ;;  %s1574_s4 = inlined_call_operand.vmem [shape: f32[3,8,1], index: 4, kind: input, shape index: {}]   ;;  %s1575_s5 = inlined_call_operand.hbm [shape: f32[3,3,8], index: 5, kind: input, shape index: {}]   ;;  %s1576_s6 = inlined_call_operand.vmem [shape: f32[3,1], index: 6, kind: input, shape index: {}]   ;;  %s1577_s7 = inlined_call_operand.vmem [shape: f32[2,3,256], index: 7, kind: output, shape index: {}]  }
   0x1   :  { %1587 = sst [smem:[#allocation16_spill]] %s1570_s0 }
   0x2   :  { %1588 = sst [smem:[#allocation17_spill]] %s1571_s1 }
   0x3   :  { %1589 = sst [smem:[#allocation18_spill]] %s1575_s5 }
   0x4   :  { %1590 = sst [smem:[#allocation19_spill]] %s1576_s6 }
   0x5   :  { %1591 = sst [smem:[#allocation20_spill]] %s1577_s7 }
   0x6   :  { %12 = vsyncpa [#allocation3], 0 }
   0x7   :  { %14 = vsyncpa [#allocation3 + $0x1], 0 }
   0x8   :  { %15 = vsyncpa [#allocation5], 0 }
   0x9   :  { %17 = vsyncpa [#allocation5 + $0x1], 0 }
   0xa   :  { %18 = vsyncpa [#allocation8], 0  ;;  %s1343_s24 = smov 0   ;;  %s1345_s25 = smov 0  }
   0xb   :  { %s1347_s26 = smov 0   ;;  %s1349_s27 = smov 0  }
   0xc   :  { %s1351_s28 = smov 0   ;;  %s1353_s29 = smov 0  }
   0xd LB: > { %1592 = sst [smem:[#allocation12_spill]] %s1287_s27  ;;  %s36_s30 = sadd.s32 1, %s1291_s28  ;;  %s1295_s29 = sphi %s1353_s29, %s24_s29   ;;  %s1291_s28 = sphi %s1351_s28, %s1612_s28   ;;  %s1287_s27 = sphi %s1349_s27, %s1611_s27   ;;  %s1283_s26 = sphi %s1347_s26, %s1615_s26   ;;  %s1279_s25 = sphi %s1345_s25, %s1614_s25   ;;  %s1275_s24 = sphi %s1343_s24, %s1613_s24  }
   0xe   : > { %1593 = sst [smem:[#allocation13_spill]] %s1291_s28  ;;  %s45_s8 = sadd.s32 1, %s1283_s26 }
   0xf   : > { %p38_p0 = scmp.ge.s32.totalorder %s36_s30, 2  ;;  %p52_p1 = scmp.ne.s32.totalorder %s1283_s26, %s1279_s25 }
  0x10   : > { %p53_p2 = scmp.eq.s32.totalorder %s1295_s29, 0  ;;  %p1051_p4 = scmp.lt.s32.totalorder %s1295_s29, 2 }
  0x11   : > { %s1617_s30 = smov (%p38_p0, %s36_s30), 0  ;;  %s1583_s10 = sand.u32 1, %s1283_s26  }
  0x12   : > { %1594 = sst [smem:[#allocation14_spill]] %s1617_s30  ;;  %p54_p3 = por %p53_p2, %p52_p1 }
  0x13   : > { %s40_s9 = ssub.s32 %s1291_s28, %s1617_s30  ;;  %s1386_s11 = sshll.u32 %s1583_s10, 6 }
  0x14   : > { %p43_p5 = scmp.eq.s32.totalorder %s40_s9, 0  ;;  %s1389_s12 = sshll.u32 %s1291_s28, 6 }
  0x15   : > { %p1391_p6 = pnand %p1051_p4, %p54_p3  ;;  %s297_s15 = sand.u32 1, %s1295_s29  }
  0x16   : > { %s1396_s14 = scalar_select %p43_p5, %s1283_s26, %s45_s8  }
  0x17   : > { %s1597_s1 = sld [smem:[#allocation17_spill]]  ;;  %s301_s19 = scalar_lea.vmem [#allocation4], %s1386_s11 }
  0x18   : > { %1596 = sst [smem:[#allocation15_spill]] %s1396_s14  ;;  %s311_s20 = sshll.u32 %s301_s19, 4  ;;  %s312_s20 = int_to_ptr.vmem [resolvable:$true] %s311_s20 }
  0x19   : > { %s1404_s22 = scalar_lea.sflag [#allocation5], %s297_s15  ;;  %s1579_s23 = smov 256  }
  0x1a   : > { %s1581_s9 = smov 16   ;;  %s1578_s8 = sadd.s32 4294967295, %s1295_s29  }
  0x1b   : > { %p58_p7 = scmp.ne.s32.totalorder %s1279_s25, %s1275_s24  ;;  %p1417_p8 = scmp.eq.s32.totalorder %s1578_s8, 0 }
  0x1c   : > { %p989_p9 = scmp.ge.s32.totalorder %s1295_s29, 1  ;;  %p237_p10 = scmp.lt.s32.totalorder %s1295_s29, 3 }
  0x1d   : > { %s308_s18 = scalar_lea.hbm %s1597_s1, %s1389_s12  ;;  %p1425_p11 = por %p1417_p8, %p58_p7 }
  0x1e   : > { %s309_s21 = sshll.u32 %s308_s18, 4  ;;  %p1429_p12 = pnand %p989_p9, %p237_p10  ;;  %s310_s21 = int_to_ptr.hbm [resolvable:$true] %s309_s21 }
  0x1f   : > { %1046 = dma.hbm_to_vmem [thread:$0]  (!%p1391_p6), %s310_s21, 1024, %s312_s20, %s1404_s22, %s1579_s23, %s1579_s23, %s1581_s9  }
  0x20   : > { %s1601_s5 = sld [smem:[#allocation18_spill]]  ;;  %p1036_p13 = pneg %p1429_p12 }
  0x21   : > { %s1299_s20 = smov [#allocation7]   ;;  %s1602_s0 = sld [smem:[#allocation16_spill]] }
  0x22   : > { %s256_s21 = sshll.u32 %s1299_s20, 4  ;;  %p1037_p0 = pnand %p1036_p13, %p1417_p8  ;;  %s257_s21 = int_to_ptr.vmem [resolvable:$true] %s256_s21 }
  0x23   : > { %s1300_s10 = smov 64   ;;  %s1301_s24 = smov 4  }
  0x24   : > { %s277_s1 = scalar_lea.vmem [#allocation2], %s1386_s11  ;;  %s1603_s30 = sand.u32 1, %s1283_s26  }
  0x25   : > { %s274_s20 = scalar_lea.sflag [#allocation3], %s1603_s30  ;;  %s1604_s28 = smov 16  }
  0x26   : > { %s254_s19 = sshll.u32 %s1601_s5, 4  ;;  %s287_s5 = sshll.u32 %s277_s1, 4  ;;  %s255_s19 = int_to_ptr.hbm [resolvable:$true] %s254_s19  ;;  %s288_s5 = int_to_ptr.vmem [resolvable:$true] %s287_s5 }
  0x27   : > { %s284_s9 = scalar_lea.hbm %s1602_s0, %s1389_s12  ;;  %s1605_s14 = smov 256  }
  0x28   : > { %1039 = dma.hbm_to_vmem [thread:$0]  (!%p1037_p0), %s255_s19, 192, %s257_s21, [#allocation8], %s1300_s10, %s1300_s10, %s1301_s24  }
  0x29   : > { %s285_s18 = sshll.u32 %s284_s9, 4  ;;  %s332_s8 = scalar_lea.hbm %s1572_s2, %s1389_s12  ;;  %s286_s18 = int_to_ptr.hbm [resolvable:$true] %s285_s18 }
  0x2a   : > { %1043 = dma.hbm_to_vmem [thread:$0]  (!%p1391_p6), %s286_s18, 1024, %s288_s5, %s274_s20, %s1605_s14, %s1605_s14, %s1604_s28  }
  0x2b   : > { %s333_s0 = sshll.u32 %s332_s8, 4  ;;  %s325_s27 = scalar_lea.vmem [#allocation6], %s1386_s11  ;;  %s334_s0 = int_to_ptr.hbm [resolvable:$true] %s333_s0 }
  0x2c   : > { %s335_s6 = sshll.u32 %s325_s27, 4  ;;  %347 = sbr.rel (%p1429_p12) target bundleno = 539 (0x21b), region = 48  ;;  %s336_s6 = int_to_ptr.vmem [resolvable:$true] %s335_s6 }
  0x2d   : > { %1049 = dma.hbm_to_vmem [thread:$0]  (!%p1391_p6), %s334_s0, 1024, %s336_s6, %s1404_s22, %s1605_s14, %s1605_s14, %s1604_s28  }
  0x2e   : > { %s349_s1 = sand.u32 (!%p1429_p12), 1, %s1279_s25  }
  0x2f   : > { %s1002_s5 = sshll.u32 (!%p1429_p12), %s349_s1, 6  ;;  %s350_s30 = scalar_lea.sflag (!%p1429_p12), [#allocation3], %s349_s1 }
  0x30   : > { %s1466_s7 = scalar_lea.vmem (!%p1429_p12), [#allocation2], %s1002_s5 }
  0x31   : > { %1262 = dma.done.wait (%p1425_p11), %s350_s30, 1024  }
  0x32   : > { %1264 = vsyncadd (%p1425_p11), %s350_s30, 4294966272  ;;  %s1606_s27 = sadd.s32 4294967295, %s1295_s29   ;;  %s1474_s6 = scalar_lea.vmem [#allocation4], %s1002_s5 }
  0x33   : > { %s359_s10 = sand.u32 1, %s1606_s27  }
  0x34   : > { %s360_s0 = scalar_lea.sflag [#allocation5], %s359_s10 }
  0x35   : > { %1266 = dma.done.wait (%p1425_p11), %s360_s0, 2048  }
  0x36   : > { %1268 = vsyncadd (%p1425_p11), %s360_s0, 4294965248  ;;  %s1480_s28 = scalar_lea.vmem [#allocation6], %s1002_s5 }
  0x37   : > { %1270 = dma.done.wait (%p1417_p8), [#allocation8], 192  }
  0x38   : > { %1272 = vsyncadd (%p1417_p8), [#allocation8], 4294967104  ;;  %v1302_v0 = vmov 0   ;;  %v453_v1 = vld [vmem:[%s1466_s7 + $0x38] sm:$0xff]  ;;  %v511_v2 = vld [vmem:[%s1474_s6 + $0x30] sm:$0xff]  ;;  %vm459_vm0 = vcmask 261120  }
  0x39   : > { %1107 = vset.pattern.permute.xlu0 %v1302_v0  ;;  %1108 = vset.pattern.permute.xlu1 %v1302_v0  ;;  %v512_v3 = vld [vmem:[%s1474_s6 + $0x38] sm:$0xff]  ;;  %v452_v4 = vld [vmem:[%s1466_s7 + $0x30] sm:$0xff]  ;;  %v451_v5 = vld [vmem:[%s1466_s7 + $0x28] sm:$0xff]  ;;  %s1607_s18 = sld [smem:[#allocation19_spill]]  ;;  %vm563_vm1 = vcmask 64512   ;;  %vm761_vm2 = vcmask 1042432  }
  0x3a   : > { %495 = vmatpush.msra.mxu1 %v453_v1  ;;  %533 = vmatpush.msra.mxu2 %v511_v2  ;;  %v509_v6 = vld [vmem:[%s1474_s6 + $0x20] sm:$0xff]  ;;  %v510_v7 = vld [vmem:[%s1474_s6 + $0x28] sm:$0xff]  ;;  %v449_v9 = vld [vmem:[%s1466_s7 + $0x18] sm:$0xff]  ;;  %s1608_s8 = sld [smem:[#allocation12_spill]]  ;;  %vm829_vm11 = vcmask 1043456  }
  0x3b   : > { %553 = vmatpush.msra.mxu3 %v512_v3  ;;  %475 = vmatpush.msra.mxu0 %v452_v4  ;;  %v450_v8 = vld [vmem:[%s1466_s7 + $0x20] sm:$0xff]  ;;  %v507_v10 = vld [vmem:[%s1474_s6 + $0x10] sm:$0xff]  ;;  %v508_v11 = vld [vmem:[%s1474_s6 + $0x18] sm:$0xff] }
  0x3c   : > { %496 = vmatpush.msra.mxu1 %v451_v5  ;;  %534 = vmatpush.msra.mxu2 %v509_v6  ;;  %v448_v12 = vld [vmem:[%s1466_s7 + $0x10] sm:$0xff]  ;;  %v447_v13 = vld [vmem:[%s1466_s7 + $0x8] sm:$0xff]  ;;  %v505_v14 = vld [vmem:[%s1474_s6] sm:$0xff] }
  0x3d   : > { %554 = vmatpush.msra.mxu3 %v510_v7  ;;  %476 = vmatpush.msra.mxu0 %v450_v8  ;;  %v506_v15 = vld [vmem:[%s1474_s6 + $0x8] sm:$0xff]  ;;  %v437_v16 = vld [vmem:[%s1573_s3] sm:$0xff]  ;;  %v442_v21 = vld [vmem:[%s1574_s4 + $0x10] sm:$0xff] }
  0x3e   : > { %497 = vmatpush.msra.mxu1 %v449_v9  ;;  %535 = vmatpush.msra.mxu2 %v507_v10  ;;  %v438_v17 = vld [vmem:[%s1573_s3 + $0x8] sm:$0xff]  ;;  %v446_v18 = vld [vmem:[%s1466_s7] sm:$0xff]  ;;  %v656_v39 = vld [vmem:[%s1480_s28 + $0x30] sm:$0xff]  ;;  %s1609_s7 = sld [smem:[#allocation20_spill]] }
  0x3f   : > { %555 = vmatpush.msra.mxu3 %v508_v11  ;;  %477 = vmatpush.msra.mxu0 %v448_v12  ;;  %v441_v19 = vld [vmem:[%s1574_s4 + $0x8] sm:$0xff]  ;;  %v440_v20 = vld [vmem:[%s1574_s4] sm:$0xff]  ;;  %v657_v40 = vld [vmem:[%s1480_s28 + $0x38] sm:$0xff] }
  0x40   : > { %498 = vmatpush.msra.mxu1 %v447_v13  ;;  %536 = vmatpush.msra.mxu2 %v505_v14  ;;  %v753_v23 = vld [vmem:[%s1607_s18] sm:$0x7]  ;;  %v444_v38 = vld [vmem:[#allocation7 + $0x4] sm:$0x7]  ;;  %v655_v42 = vld [vmem:[%s1480_s28 + $0x28] sm:$0xff]  ;;  %p428_p1 = scmp.lt.s32.totalorder %s1608_s8, 1 }
  0x41   : > { %556 = vmatpush.msra.mxu3 %v506_v15  ;;  %1009 = vmatmul.msk.f32.vlgmr.msra.gmra.mxu1 %vm459_vm0, %v437_v16  ;;  %v443_v29 = vld [vmem:[#allocation7] sm:$0x7]  ;;  %v652_v43 = vld [vmem:[%s1480_s28 + $0x10] sm:$0xff]  ;;  %v653_v44 = vld [vmem:[%s1480_s28 + $0x18] sm:$0xff] }
  0x42   : > { %1010 = vmatmul.msk.f32.vlgmr.msra.gmra.mxu2 %vm459_vm0, %v438_v17  ;;  %1011 = vmatmul.msk.f32.vlgmr.msra.gmra.mxu3 %vm459_vm0, %v438_v17  ;;  %v654_v41 = vld [vmem:[%s1480_s28 + $0x20] sm:$0xff]  ;;  %v651_v46 = vld [vmem:[%s1480_s28 + $0x8] sm:$0xff]  ;;  %v439_v47 = vld [vmem:[%s1573_s3 + $0x10] sm:$0xff]  ;;  %s1619_s8 = smov (!%p428_p1, %s1608_s8), 1 }
  0x43   : > { %478 = vmatpush.msra.mxu0 %v446_v18  ;;  %515 = vperm.xlu0 %1107, %v441_v19   ;;  %v650_v45 = vld [vmem:[%s1480_s28] sm:$0xff]  ;;  %v445_v57 = vld [vmem:[#allocation7 + $0x8] sm:$0x7]  ;;  %s1025_s1 = sshll.u32 %s1619_s8, 3 }
  0x44   : > { %1008 = vmatmul.msk.f32.vlgmr.msra.gmra.mxu0 %vm459_vm0, %v437_v16  ;;  %660 = vperm.xlu1 %1108, %v442_v21   ;;  %s435_s27 = scalar_lea.vmem %s1609_s7, %s1025_s1 }
  0x4b   : > { %456 = vperm.xlu0 %1107, %v440_v20  }
  0x4c   : > { %756 = vperm.xlu1 %1108, %v753_v23  }
  0xb5   : > { %v516_v22 = vpop.permute.xlu0 %515 }
  0xb6   : > { %v661_v50 = vpop.permute.xlu1 %660 }
  0xbd   : > { %v457_v24 = vpop.permute.xlu0 %456 }
  0xbe   : > { %v500_v25 = vpop.f32.mrf.mxu1  ;;  %v757_v2 = vpop.permute.xlu1 %756 }
  0xbf   : > { %v501_v26 = vadd.f32 %v500_v25, %v457_v24 }
  0xc1   : > { %v504_v27 = vmax.f32 %v501_v26, 0.0  ;;  %v480_v28 = vpop.f32.mrf.mxu0 }
  0xc2   : > { %v481_v30 = vadd.f32 %v480_v28, %v457_v24 }
  0xc3   : > { %645 = vmatpush.msrb.mxu3 %v504_v27 }
  0xc4   : > { %v503_v31 = vmax.f32 %v481_v30, 0.0  ;;  %1015 = vmatmul.msk.f32.vlgmr.msrb.gmra.mxu3 %vm563_vm1, %v443_v29 }
  0xc5   : > { %v538_v32 = vpop.f32.mrf.mxu2  ;;  %v558_v33 = vpop.f32.mrf.mxu3 }
  0xc6   : > { %v539_v34 = vadd.f32 %v538_v32, %v516_v22  ;;  %v559_v35 = vadd.f32 %v558_v33, %v516_v22  ;;  %625 = vmatpush.msrb.mxu2 %v503_v31 }
  0xc7   : > { %1014 = vmatmul.msk.f32.vlgmr.msrb.gmra.mxu2 %vm563_vm1, %v443_v29 }
  0xc8   : > { %v561_v36 = vmax.f32 %v539_v34, 0.0  ;;  %v562_v37 = vmax.f32 %v559_v35, 0.0 }
  0xca   : > { %582 = vmatpush.msrb.mxu0 %v561_v36  ;;  %602 = vmatpush.msrb.mxu1 %v562_v37 }
  0xcb   : > { %1012 = vmatmul.msk.f32.vlgmr.msrb.gmra.mxu0 %vm563_vm1, %v444_v38  ;;  %1013 = vmatmul.msk.f32.vlgmr.msrb.gmra.mxu1 %vm563_vm1, %v444_v38 }
  0xcc   : > { %678 = vmatpush.msra.mxu0 %v656_v39  ;;  %698 = vmatpush.msra.mxu1 %v657_v40 }
  0xce   : > { %679 = vmatpush.msra.mxu0 %v654_v41  ;;  %699 = vmatpush.msra.mxu1 %v655_v42 }
  0xd0   : > { %680 = vmatpush.msra.mxu0 %v652_v43  ;;  %700 = vmatpush.msra.mxu1 %v653_v44 }
  0xd2   : > { %681 = vmatpush.msra.mxu0 %v650_v45  ;;  %701 = vmatpush.msra.mxu1 %v651_v46 }
  0xd3   : > { %1016 = vmatmul.msk.f32.vlgmr.msra.gmra.mxu0 %vm459_vm0, %v439_v47  ;;  %1017 = vmatmul.msk.f32.vlgmr.msra.gmra.mxu1 %vm459_vm0, %v439_v47 }
 0x147   : > { %v647_v58 = vpop.f32.mrf.mxu3 }
 0x148   : > { %v584_v48 = vpop.f32.mrf.mxu0  ;;  %v604_v49 = vpop.f32.mrf.mxu1 }
 0x149   : > { %v648_v60 = vadd.f32 %v647_v58, %v604_v49 }
 0x14a   : > { %v627_v59 = vpop.f32.mrf.mxu2 }
 0x14b   : > { %v628_v61 = vadd.f32 %v627_v59, %v584_v48 }
 0x150   : > { %v683_v51 = vpop.f32.mrf.mxu0  ;;  %v703_v52 = vpop.f32.mrf.mxu1 }
 0x151   : > { %v684_v53 = vadd.f32 %v683_v51, %v661_v50  ;;  %v704_v54 = vadd.f32 %v703_v52, %v661_v50 }
 0x153   : > { %v706_v55 = vmax.f32 %v684_v53, 0.0  ;;  %v707_v56 = vmax.f32 %v704_v54, 0.0 }
 0x155   : > { %726 = vmatpush.msra.mxu2 %v706_v55  ;;  %746 = vmatpush.msra.mxu3 %v707_v56 }
 0x156   : > { %1018 = vmatmul.msk.f32.vlgmr.msra.gmra.mxu2 %vm563_vm1, %v445_v57  ;;  %1019 = vmatmul.msk.f32.vlgmr.msra.gmra.mxu3 %vm563_vm1, %v445_v57 }
 0x1d9   : > { %v728_v62 = vpop.f32.mrf.mxu2  ;;  %v748_v63 = vpop.f32.mrf.mxu3 }
 0x1da   : > { %v751_v0 = vadd.f32 %v728_v62, %v628_v61  ;;  %v752_v1 = vadd.f32 %v748_v63, %v648_v60 }
 0x1dc   : > { %v759_v3 = vadd.f32 %v757_v2, %v751_v0  ;;  %v760_v4 = vadd.f32 %v757_v2, %v752_v1 }
 0x1de   : > { %v762_v5 = vsel %vm761_vm2, %v759_v3, -inf  ;;  %v769_v6 = vsel %vm761_vm2, %v760_v4, -inf }
 0x1df   : > { %v763_v7 = vrot.slane %v762_v5, 4  ;;  %v770_v8 = vrot.slane %v769_v6, 4 }
 0x1e1   : > { %v764_v9 = vmax.f32 %v762_v5, %v763_v7  ;;  %v771_v10 = vmax.f32 %v769_v6, %v770_v8 }
 0x1e3   : > { %v765_v11 = vrot.slane %v764_v9, 2  ;;  %v772_v12 = vrot.slane %v771_v10, 2 }
 0x1e5   : > { %v766_v13 = vmax.f32 %v764_v9, %v765_v11  ;;  %v773_v14 = vmax.f32 %v771_v10, %v772_v12 }
 0x1e7   : > { %v767_v15 = vrot.slane %v766_v13, 1  ;;  %v774_v16 = vrot.slane %v773_v14, 1 }
 0x1e9   : > { %v768_v17 = vmax.f32 %v766_v13, %v767_v15  ;;  %v775_v18 = vmax.f32 %v773_v14, %v774_v16 }
 0x1eb   : > { %v776_v19 = vsub.f32 %v759_v3, %v768_v17  ;;  %v777_v20 = vsub.f32 %v760_v4, %v775_v18 }
 0x1ed   : > { %v778_v21 = vmul.f32 1.442695, %v776_v19  ;;  %v780_v22 = vmul.f32 1.442695, %v777_v20 }
 0x1ef   : > { %1109 = vpow2.f32 %v778_v21 }
 0x1f0   : > { %1111 = vpow2.f32 %v780_v22 }
 0x1f5   : > { %v1110_v23 = vpop.eup %1109 }
 0x1f6   : > { %v1112_v24 = vpop.eup %1111  ;;  %v782_v25 = vsel %vm761_vm2, %v1110_v23, 0.0 }
 0x1f7   : > { %v783_v26 = vrot.slane %v782_v25, 4  ;;  %v789_v27 = vsel %vm761_vm2, %v1112_v24, 0.0 }
 0x1f8   : > { %v790_v28 = vrot.slane %v789_v27, 4 }
 0x1f9   : > { %v784_v29 = vadd.f32 %v783_v26, %v782_v25 }
 0x1fa   : > { %v791_v30 = vadd.f32 %v790_v28, %v789_v27 }
 0x1fb   : > { %v785_v31 = vrot.slane %v784_v29, 2 }
 0x1fc   : > { %v792_v32 = vrot.slane %v791_v30, 2 }
 0x1fd   : > { %v786_v33 = vadd.f32 %v785_v31, %v784_v29 }
 0x1fe   : > { %v793_v34 = vadd.f32 %v792_v32, %v791_v30 }
 0x1ff   : > { %v787_v35 = vrot.slane %v786_v33, 1 }
 0x200   : > { %v794_v36 = vrot.slane %v793_v34, 1 }
 0x201   : > { %v788_v37 = vadd.f32 %v787_v35, %v786_v33 }
 0x202   : > { %v795_v38 = vadd.f32 %v794_v36, %v793_v34 }
 0x203   : > { %1113 = vrcp.f32 %v788_v37  ;;  %v807_v46 = vand.u32 2147483648, %v788_v37  ;;  %v805_v48 = vand.u32 2147483647, %v788_v37  ;;  %vm801_vm5 = vweird.f32 %v788_v37 }
 0x204   : > { %1115 = vrcp.f32 %v795_v38  ;;  %v822_v47 = vand.u32 2147483648, %v795_v38  ;;  %v820_v50 = vand.u32 2147483647, %v795_v38  ;;  %vm816_vm7 = vweird.f32 %v795_v38 }
 0x205   : > { %v808_v54 = vor.u32 1.1754944e-38, %v807_v46  ;;  %vm806_vm9 = vcmp.eq.f32.partialorder %v805_v48, 8.507059e+37 }
 0x206   : > { %v823_v55 = vor.u32 1.1754944e-38, %v822_v47  ;;  %vm821_vm10 = vcmp.eq.f32.partialorder %v820_v50, 8.507059e+37 }
 0x209   : > { %v1114_v39 = vpop.eup %1113 }
 0x20a   : > { %v1116_v40 = vpop.eup %1115  ;;  %v797_v41 = vmul.f32 %v1114_v39, %v788_v37  ;;  %vm802_vm3 = vweird.f32 %v1114_v39 }
 0x20b   : > { %v812_v42 = vmul.f32 %v1116_v40, %v795_v38  ;;  %vm817_vm4 = vweird.f32 %v1116_v40  ;;  %vm803_vm6 = vmor %vm801_vm5, %vm802_vm3 }
 0x20c   : > { %v798_v43 = vsub.f32 1.0, %v797_v41  ;;  %vm818_vm8 = vmor %vm816_vm7, %vm817_vm4 }
 0x20d   : > { %v813_v44 = vsub.f32 1.0, %v812_v42 }
 0x20e   : > { %v799_v45 = vmul.f32 %v1114_v39, %v798_v43 }
 0x20f   : > { %v814_v49 = vmul.f32 %v1116_v40, %v813_v44 }
 0x210   : > { %v800_v51 = vadd.f32 %v1114_v39, %v799_v45 }
 0x211   : > { %v815_v52 = vadd.f32 %v1116_v40, %v814_v49 }
 0x212   : > { %v804_v53 = vsel %vm803_vm6, %v1114_v39, %v800_v51 }
 0x213   : > { %v819_v56 = vsel %vm818_vm8, %v1116_v40, %v815_v52  ;;  %v809_v57 = vsel %vm806_vm9, %v808_v54, %v804_v53 }
 0x214   : > { %v824_v58 = vsel %vm821_vm10, %v823_v55, %v819_v56  ;;  %v810_v60 = vmul.f32 %v1110_v23, %v809_v57 }
 0x215   : > { %v825_v59 = vmul.f32 %v1112_v24, %v824_v58 }
 0x217   : > { %v828_v61 = vrot.slane %v825_v59, 4 }
 0x219   : > { %v830_v62 = vsel %vm829_vm11, %v810_v60, %v828_v61 }
 0x21a   : > { %832 = vst [vmem:[%s435_s27] sm:$0x77] %v830_v62 }
 0x21b PF: > { %s24_s29 = sadd.s32 1, %s1295_s29   ;;  %s1610_s10 = sld [smem:[#allocation15_spill]] }
 0x21c   : > { %p21_p2 = scmp.ge.s32.totalorder %s24_s29, 4   ;;  %s1611_s27 = sld [smem:[#allocation13_spill]] }
 0x21d   : > { %s1612_s28 = sld [smem:[#allocation14_spill]]  ;;  %s1613_s24 = smov %s1279_s25 }
 0x21e   : > { %s1614_s25 = smov %s1283_s26  ;;  %23 = sbr.rel (!%p21_p2) target bundleno = 13 (0xd), region = 116 }
 0x221   : > { %s1615_s26 = smov %s1610_s10 }
 0x223   :  { %863 = vsyncpa [#allocation3], 1 }
 0x224   :  { %865 = vsyncpa [#allocation3 + $0x1], 1 }
 0x225   :  { %866 = vsyncpa [#allocation5], 1 }
 0x226   :  { %868 = vsyncpa [#allocation5 + $0x1], 1 }
 0x227   :  { %869 = vsyncpa [#allocation8], 1 }

</bundles_post_ra>
